<compile_context>
chip_gen: v7x
topology: tpu7x:2x2x1
jax: 0.10.0
libtpu: 0.0.40
codegen_flags: <defaults>
</compile_context>

<pallas_src>
import functools

import jax
import jax.numpy as jnp
from jax.experimental import pallas as pl
from jax.experimental.pallas import tpu as pltpu


def pack_params(w_ih, b_ih, w_io, b_io, input_size):
    """Pack the two nn.Linear params into a split, pre-transposed form.

    w_ih: [H, in+H], b_ih: [H], w_io: [O, in+H], b_io: [O]  (PyTorch layout).
    Returns (wx [in, H+O], wh [H, H+O], b [1, H+O]).  Done ONCE, outside the
    per-step path.
    """
    w_packed = jnp.concatenate([w_ih, w_io], axis=0).T    # [in+H, H+O]
    wx = w_packed[:input_size]                            # [in, H+O]
    wh = w_packed[input_size:]                            # [H, H+O]
    b = jnp.concatenate([b_ih, b_io]).reshape(1, -1)      # [1, H+O]
    return wx, wh, b


def _project_and_split(x, h, wx, wh, b, hidden_size):
    # One packed projection, equivalent to cat(x, h) @ [W_ih ; W_io]^T + b,
    # without the lane-axis concat (split matmul accumulates instead).
    y = (jnp.dot(x, wx, preferred_element_type=jnp.float32)
         + jnp.dot(h, wh, preferred_element_type=jnp.float32)
         + b)
    new_hidden = y[:, :hidden_size]
    logits = y[:, hidden_size:]
    # LogSoftmax(dim=1), numerically stabilized.
    m = jnp.max(logits, axis=1, keepdims=True)
    shifted = logits - m
    lse = jnp.log(jnp.sum(jnp.exp(shifted), axis=1, keepdims=True))
    return new_hidden, shifted - lse


# ---------------------------------------------------------------------------
# Single-step kernel: matches RNN.forward(input, hidden) semantics exactly.
# ---------------------------------------------------------------------------
def rnn_step_kernel(x_ref, h_ref, wx_ref, wh_ref, b_ref, out_ref, hid_ref, *,
                    hidden_size):
    new_hidden, log_probs = _project_and_split(
        x_ref[...], h_ref[...], wx_ref[...], wh_ref[...], b_ref[...],
        hidden_size)
    out_ref[...] = log_probs.astype(out_ref.dtype)
    hid_ref[...] = new_hidden.astype(hid_ref.dtype)


def rnn_step(x, hidden, wx, wh, b):
    """x: [B, input_size], hidden: [B, hidden_size]; packed params from
    pack_params().  Returns (log_softmax output [B, O], new hidden [B, H])."""
    B = x.shape[0]
    hidden_size = wh.shape[0]
    output_size = wx.shape[1] - hidden_size

    vmem = pl.BlockSpec(memory_space=pltpu.MemorySpace.VMEM)
    return pl.pallas_call(
        functools.partial(rnn_step_kernel, hidden_size=hidden_size),
        out_shape=(jax.ShapeDtypeStruct((B, output_size), jnp.float32),
                   jax.ShapeDtypeStruct((B, hidden_size), jnp.float32)),
        in_specs=[vmem] * 5,
        out_specs=(vmem, vmem),
        input_output_aliases={1: 1},   # hidden state updated in place
    )(x, hidden, wx, wh, b)


# ---------------------------------------------------------------------------
# Sequence kernel: full recurrence over T timesteps inside ONE pallas_call.
# Grid iterates over blocks of `steps_per_block` timesteps (unrolled in the
# kernel body); hidden state is carried in vregs within a block and in a VMEM
# scratch across blocks.  Packed weights stay VMEM-resident.
# ---------------------------------------------------------------------------
def rnn_seq_kernel(x_ref, h0_ref, wx_ref, wh_ref, b_ref,
                   out_ref, hfin_ref, h_scratch, *,
                   hidden_size, steps_per_block):
    blk = pl.program_id(0)

    @pl.when(blk == 0)
    def _():
        h_scratch[...] = h0_ref[...]

    h = h_scratch[...]
    wx = wx_ref[...]
    wh = wh_ref[...]
    b = b_ref[...]

    # Static unroll over the timesteps of this block; the recurrence is
    # serial anyway, so unrolling just removes per-step loop/grid overhead.
    for s in range(steps_per_block):
        h, log_probs = _project_and_split(x_ref[s], h, wx, wh, b, hidden_size)
        out_ref[s] = log_probs.astype(out_ref.dtype)

    h_scratch[...] = h

    @pl.when(blk == pl.num_programs(0) - 1)
    def _():
        hfin_ref[...] = h.astype(hfin_ref.dtype)


def _pick_steps_per_block(T, max_steps=8):
    """Largest divisor of T that is <= max_steps (keeps the grid exact)."""
    ts = 1
    for cand in range(1, min(T, max_steps) + 1):
        if T % cand == 0:
            ts = cand
    return ts


def rnn_sequence(x_seq, h0, wx, wh, b, *, max_steps_per_block=8):
    """x_seq: [T, B, input_size], h0: [B, hidden_size].
    Returns (log-probs [T, B, output_size], final hidden [B, hidden_size])."""
    T, B, input_size = x_seq.shape
    hidden_size = wh.shape[0]
    output_size = wx.shape[1] - hidden_size
    P = hidden_size + output_size

    ts = _pick_steps_per_block(T, max_steps_per_block)
    n_blocks = T // ts

    grid_spec = pltpu.PrefetchScalarGridSpec(
        num_scalar_prefetch=0,
        grid=(n_blocks,),
        in_specs=[
            pl.BlockSpec((ts, B, input_size), lambda i: (i, 0, 0)),  # x block
            pl.BlockSpec((B, hidden_size), lambda i: (0, 0)),        # h0 (resident)
            pl.BlockSpec((input_size, P), lambda i: (0, 0)),         # wx (resident)
            pl.BlockSpec((hidden_size, P), lambda i: (0, 0)),        # wh (resident)
            pl.BlockSpec((1, P), lambda i: (0, 0)),                  # b  (resident)
        ],
        out_specs=(
            pl.BlockSpec((ts, B, output_size), lambda i: (i, 0, 0)),  # per-step out
            pl.BlockSpec((B, hidden_size), lambda i: (0, 0)),         # final hidden
        ),
        scratch_shapes=[pltpu.VMEM((B, hidden_size), jnp.float32)],
    )
    return pl.pallas_call(
        functools.partial(rnn_seq_kernel, hidden_size=hidden_size,
                          steps_per_block=ts),
        out_shape=(jax.ShapeDtypeStruct((T, B, output_size), jnp.float32),
                   jax.ShapeDtypeStruct((B, hidden_size), jnp.float32)),
        grid_spec=grid_spec,
        compiler_params=pltpu.CompilerParams(
            dimension_semantics=("arbitrary",)),   # recurrence: sequential axis
    )(x_seq, h0, wx, wh, b)


if __name__ == "__main__":
    batch = 2
    input_size = 16
    hidden_size = 32
    output_size = 8
    seq_len = 8

    key = jax.random.PRNGKey(0)
    k_x, k_wih, k_bih, k_wio, k_bio = jax.random.split(key, 5)

    x_seq = jax.random.normal(k_x, (seq_len, batch, input_size), jnp.float32)
    h0 = jnp.zeros((batch, hidden_size), jnp.float32)   # initHidden()-style

    # Deterministic nn.Linear-like init: uniform(-1/sqrt(fan_in), 1/sqrt(fan_in))
    fan_in = input_size + hidden_size
    bound = 1.0 / (fan_in ** 0.5)
    w_ih = jax.random.uniform(k_wih, (hidden_size, fan_in),
                              minval=-bound, maxval=bound, dtype=jnp.float32)
    b_ih = jax.random.uniform(k_bih, (hidden_size,),
                              minval=-bound, maxval=bound, dtype=jnp.float32)
    w_io = jax.random.uniform(k_wio, (output_size, fan_in),
                              minval=-bound, maxval=bound, dtype=jnp.float32)
    b_io = jax.random.uniform(k_bio, (output_size,),
                              minval=-bound, maxval=bound, dtype=jnp.float32)

    # Pack / transpose the nn.Linear params ONCE (hoisted out of the step path).
    wx, wh, b = pack_params(w_ih, b_ih, w_io, b_io, input_size)

    # ---- single step: same semantics as RNN.forward(input, hidden) ----
    x0 = x_seq[0]
    out_step, h_step = jax.jit(rnn_step)(x0, h0, wx, wh, b)
    jax.block_until_ready((out_step, h_step))

    combined = jnp.concatenate([x0, h0], axis=1)
    ref_h = combined @ w_ih.T + b_ih
    ref_out = jax.nn.log_softmax(combined @ w_io.T + b_io, axis=1)
    assert jnp.allclose(out_step, ref_out, atol=1e-5, rtol=1e-5)
    assert jnp.allclose(h_step, ref_h, atol=1e-5, rtol=1e-5)

    # ---- full recurrence folded into a single pallas_call ----
    out_seq, h_final = jax.jit(rnn_sequence)(x_seq, h0, wx, wh, b)
    jax.block_until_ready((out_seq, h_final))

    def ref_scan_step(h, x_t):
        c = jnp.concatenate([x_t, h], axis=1)
        h_new = c @ w_ih.T + b_ih
        o = jax.nn.log_softmax(c @ w_io.T + b_io, axis=1)
        return h_new, o

    ref_hfin, ref_outs = jax.lax.scan(ref_scan_step, h0, x_seq)
    assert jnp.allclose(out_seq, ref_outs, atol=1e-5, rtol=1e-5)
    assert jnp.allclose(h_final, ref_hfin, atol=1e-5, rtol=1e-5)

    print("KERNEL_OK")
</pallas_src>

<mosaic_0001>
module attributes {stable_mosaic.version = 11 : i64} {
  func.func @rnn_step_kernel(%arg0: memref<2x16xf32, #tpu.memory_space<vmem>>, %arg1: memref<2x32xf32, #tpu.memory_space<vmem>>, %arg2: memref<16x40xf32, #tpu.memory_space<vmem>>, %arg3: memref<32x40xf32, #tpu.memory_space<vmem>>, %arg4: memref<1x40xf32, #tpu.memory_space<vmem>>, %arg5: memref<2x8xf32, #tpu.memory_space<vmem>>, %arg6: memref<2x32xf32, #tpu.memory_space<vmem>>) attributes {dimension_semantics = [], scalar_prefetch = 0 : i64, scratch_operands = 0 : i64, tpu.core_type = #tpu.core_type<tc>} {
    %c0 = arith.constant 0 : index
    %c0_0 = arith.constant 0 : index
    %0 = vector.load %arg0[%c0, %c0_0] : memref<2x16xf32, #tpu.memory_space<vmem>>, vector<2x16xf32>
    %c0_1 = arith.constant 0 : index
    %c0_2 = arith.constant 0 : index
    %1 = vector.load %arg1[%c0_1, %c0_2] : memref<2x32xf32, #tpu.memory_space<vmem>>, vector<2x32xf32>
    %c0_3 = arith.constant 0 : index
    %c0_4 = arith.constant 0 : index
    %2 = vector.load %arg2[%c0_3, %c0_4] : memref<16x40xf32, #tpu.memory_space<vmem>>, vector<16x40xf32>
    %c0_5 = arith.constant 0 : index
    %c0_6 = arith.constant 0 : index
    %3 = vector.load %arg3[%c0_5, %c0_6] : memref<32x40xf32, #tpu.memory_space<vmem>>, vector<32x40xf32>
    %c0_7 = arith.constant 0 : index
    %c0_8 = arith.constant 0 : index
    %4 = vector.load %arg4[%c0_7, %c0_8] : memref<1x40xf32, #tpu.memory_space<vmem>>, vector<1x40xf32>
    %cst = arith.constant dense<0.000000e+00> : vector<2x40xf32>
    %5 = tpu.matmul %0, %2, %cst {dimension_numbers = #tpu.dot_dimension_numbers<[1], [0], [0], [1], [0, 0, 1, 1], [], []>} : vector<2x16xf32>, vector<16x40xf32>, vector<2x40xf32> -> vector<2x40xf32>
    %cst_9 = arith.constant dense<0.000000e+00> : vector<2x40xf32>
    %6 = tpu.matmul %1, %3, %cst_9 {dimension_numbers = #tpu.dot_dimension_numbers<[1], [0], [0], [1], [0, 0, 1, 1], [], []>} : vector<2x32xf32>, vector<32x40xf32>, vector<2x40xf32> -> vector<2x40xf32>
    %7 = arith.addf %5, %6 : vector<2x40xf32>
    %8 = vector.broadcast %4 : vector<1x40xf32> to vector<2x40xf32>
    %9 = arith.addf %7, %8 : vector<2x40xf32>
    %10 = vector.extract_strided_slice %9 {offsets = [0, 0], sizes = [2, 32], strides = [1, 1]} : vector<2x40xf32> to vector<2x32xf32>
    %11 = vector.extract_strided_slice %9 {offsets = [0, 32], sizes = [2, 8], strides = [1, 1]} : vector<2x40xf32> to vector<2x8xf32>
    %cst_10 = arith.constant dense<0xFF800000> : vector<2xf32>
    %12 = vector.multi_reduction <maximumf>, %11, %cst_10 [1] : vector<2x8xf32> to vector<2xf32>
    %13 = vector.shape_cast %12 : vector<2xf32> to vector<2x1xf32>
    %14 = vector.broadcast %13 : vector<2x1xf32> to vector<2x8xf32>
    %15 = arith.subf %11, %14 : vector<2x8xf32>
    %16 = math.exp %15 : vector<2x8xf32>
    %cst_11 = arith.constant dense<0.000000e+00> : vector<2xf32>
    %17 = vector.multi_reduction <add>, %16, %cst_11 [1] : vector<2x8xf32> to vector<2xf32>
    %18 = vector.shape_cast %17 : vector<2xf32> to vector<2x1xf32>
    %19 = math.log %18 : vector<2x1xf32>
    %20 = vector.broadcast %19 : vector<2x1xf32> to vector<2x8xf32>
    %21 = arith.subf %15, %20 : vector<2x8xf32>
    %c0_12 = arith.constant 0 : index
    %c0_13 = arith.constant 0 : index
    %22 = vector.load %arg5[%c0_12, %c0_13] : memref<2x8xf32, #tpu.memory_space<vmem>>, vector<2x8xf32>
    tpu.vector_store %arg5[%c0_12, %c0_13], %21 {strides = array<i32>} : memref<2x8xf32, #tpu.memory_space<vmem>>, vector<2x8xf32>,
    %c0_14 = arith.constant 0 : index
    %c0_15 = arith.constant 0 : index
    %23 = vector.load %arg6[%c0_14, %c0_15] : memref<2x32xf32, #tpu.memory_space<vmem>>, vector<2x32xf32>
    tpu.vector_store %arg6[%c0_14, %c0_15], %10 {strides = array<i32>} : memref<2x32xf32, #tpu.memory_space<vmem>>, vector<2x32xf32>,
    return
  }
}

</mosaic_0001>

<bundles_post_ra>
// kernel: rnn_step.1
= control target key start
LH: loop header
LB: loop body
LE: loop exit
PB: predicated region body
PF: predicated region fallthrough
CT: control target
= control target key end

     0   :  { %12 = vsyncpa [#allocation3], 0  ;;  %s573_s0 = inlined_call_operand.vmem [shape: f32[2,16], index: 0, kind: input, shape index: {}]   ;;  %s574_s1 = inlined_call_operand.hbm [shape: f32[2,32], index: 1, kind: input, shape index: {}, may-alias: {1,6}]   ;;  %s575_s2 = inlined_call_operand.hbm [shape: f32[16,40], index: 2, kind: input, shape index: {}]   ;;  %s576_s3 = inlined_call_operand.hbm [shape: f32[32,40], index: 3, kind: input, shape index: {}]   ;;  %s577_s4 = inlined_call_operand.vmem [shape: f32[1,40], index: 4, kind: input, shape index: {}]   ;;  %s578_s5 = inlined_call_operand.hbm [shape: f32[2,8], index: 5, kind: output, shape index: {0}]   ;;  %s579_s6 = inlined_call_operand.hbm [shape: f32[2,32], index: 6, kind: output, shape index: {1}, may-alias: {1,6}]  }
   0x1   :  { %13 = vsyncpa [#allocation6], 0 }
   0x2   :  { %14 = vsyncpa [#allocation4], 0 }
   0x3   :  { %15 = vsyncpa [#allocation10], 0  ;;  %s453_s21 = smov [#allocation5]   ;;  %s335_s25 = scalar_lea.hbm %s575_s2, 256 }
   0x4   :  { %s33_s22 = sshll.u32 %s453_s21, 4  ;;  %p336_p0 = scmp.ne.s32.totalorder %s575_s2, %s335_s25  ;;  %s34_s22 = int_to_ptr.vmem [resolvable:$true] %s33_s22 }
   0x5   :  { %p339_p1 = scmp.lt.u32.totalorder %s335_s25, %s575_s2 }
   0x7   :  { %p341_p2 = pnand %p339_p1, %p336_p0 }
   0x9   :  { %344 = shalt.err (!%p341_p2)
}
   0xa   :  { %s345_s30 = scalar_lea.vmem %s34_s22, 256  ;;  %p350_p4 = scmp.lt.s32.totalorder %s34_s22, %s34_s22 }
   0xb   :  { %p346_p3 = scmp.ne.s32.totalorder %s34_s22, %s345_s30  ;;  %p351_p5 = scmp.lt.s32.totalorder %s345_s30, %s345_s30 }
   0xd   :  { %p352_p6 = por %p351_p5, %p350_p4 }
   0xf   :  { %p353_p7 = pnand %p352_p6, %p346_p3 }
  0x11   :  { %356 = shalt.err (!%p353_p7)
}
  0x12   :  { %s454_s7 = smov 128   ;;  %s455_s8 = smov 8  }
  0x13   :  { %39 = dma.hbm_to_vmem [thread:$0]  %s575_s2, 256, %s34_s22, [#allocation6], %s454_s7, %s454_s7, %s455_s8  }
  0x14   :  { %s456_s11 = smov [#allocation2]   ;;  %s457_s13 = smov [#allocation7]  }
  0x15   :  { %s24_s12 = sshll.u32 %s456_s11, 4  ;;  %s45_s14 = sshll.u32 %s457_s13, 4  ;;  %s25_s12 = int_to_ptr.vmem [resolvable:$true] %s24_s12  ;;  %s46_s14 = int_to_ptr.vmem [resolvable:$true] %s45_s14 }
  0x16   :  { %s357_s17 = scalar_lea.hbm %s574_s1, 32 }
  0x17   :  { %p358_p8 = scmp.ne.s32.totalorder %s574_s1, %s357_s17  ;;  %p361_p9 = scmp.lt.u32.totalorder %s357_s17, %s574_s1 }
  0x19   :  { %p363_p10 = pnand %p361_p9, %p358_p8 }
  0x1b   :  { %366 = shalt.err (!%p363_p10)
}
  0x1c   :  { %s367_s2 = scalar_lea.vmem %s25_s12, 32  ;;  %p372_p12 = scmp.lt.s32.totalorder %s25_s12, %s25_s12 }
  0x1d   :  { %p368_p11 = scmp.ne.s32.totalorder %s25_s12, %s367_s2  ;;  %p373_p13 = scmp.lt.s32.totalorder %s367_s2, %s367_s2 }
  0x1f   :  { %p374_p0 = por %p373_p13, %p372_p12 }
  0x21   :  { %p375_p1 = pnand %p374_p0, %p368_p11 }
  0x23   :  { %378 = shalt.err (!%p375_p1)
}
  0x24   :  { %27 = dma.hbm_to_vmem [thread:$0]  %s574_s1, 32, %s25_s12, [#allocation3]  }
  0x25   :  { %s379_s26 = scalar_lea.hbm %s576_s3, 512 }
  0x26   :  { %p380_p2 = scmp.ne.s32.totalorder %s576_s3, %s379_s26  ;;  %p383_p3 = scmp.lt.u32.totalorder %s379_s26, %s576_s3 }
  0x28   :  { %p385_p4 = pnand %p383_p3, %p380_p2 }
  0x2a   :  { %388 = shalt.err (!%p385_p4)
}
  0x2b   :  { %s389_s9 = scalar_lea.vmem %s46_s14, 512  ;;  %p394_p6 = scmp.lt.s32.totalorder %s46_s14, %s46_s14 }
  0x2c   :  { %p390_p5 = scmp.ne.s32.totalorder %s46_s14, %s389_s9  ;;  %p395_p7 = scmp.lt.s32.totalorder %s389_s9, %s389_s9 }
  0x2e   :  { %p396_p8 = por %p395_p7, %p394_p6 }
  0x30   :  { %p397_p9 = pnand %p396_p8, %p390_p5 }
  0x32   :  { %400 = shalt.err (!%p397_p9)
}
  0x33   :  { %51 = dma.hbm_to_vmem [thread:$0]  %s576_s3, 512, %s46_s14, [#allocation6], %s454_s7, %s454_s7, %s455_s8  }
  0x34   :  { %445 = dma.done.wait [#allocation3], 32  }
  0x35   :  { %446 = vsyncadd [#allocation3], 4294967264 }
  0x36   :  { %447 = dma.done.wait [#allocation6], 768  }
  0x37   :  { %448 = vsyncadd [#allocation6], 4294966528  ;;  %v458_v0 = vmov 0.0|0.0   ;;  %vm459_vm0 = vmmov 0   ;;  %v460_v1 = vmov 0.0   ;;  %v67_v2 = vld [vmem:[#allocation7] sm:$0xff] }
  0x38   :  { %311 = vmatprep.subr.bf16.mxu0 %v458_v0  ;;  %317 = vmatprep.subr.bf16.mxu1 %v458_v0  ;;  %v68_v3 = vld [vmem:[#allocation7 + $0x8] sm:$0xff]  ;;  %v65_v4 = vld [vmem:[#allocation5] sm:$0xff]  ;;  %v66_v6 = vld [vmem:[#allocation5 + $0x8] sm:$0xff]  ;;  %vm146_vm1 = vcmask 130048   ;;  %vm72_vm2 = vcmask 261120   ;;  %vm227_vm3 = vcmask 320768  }
  0x39   :  { %308 = vmatprep.mubr.msk.f32.mxu1 %vm459_vm0, %v460_v1  ;;  %301 = vmatprep.mubr.msk.f32.mxu0 %vm459_vm0, %v460_v1  ;;  %v312_v5 = vpack.c.bf16 %v68_v3, %v67_v2  ;;  %v69_v7 = vld [vmem:[#allocation7 + $0x10] sm:$0xff]  ;;  %v70_v8 = vld [vmem:[#allocation7 + $0x18] sm:$0xff]  ;;  %v318_v9 = vpack.c.bf16 %v66_v6, %v65_v4  ;;  %v63_v11 = vld [vmem:[%s573_s0] sm:$0x3]  ;;  %vm250_vm4 = vcmask 254976   ;;  %s461_s0 = smov 96  }
  0x3a   :  { %v315_v10 = vpack.c.bf16 %v70_v8, %v69_v7  ;;  %v64_v12 = vld [vmem:[#allocation2] sm:$0x3]  ;;  %vm238_vm5 = vcmask 58368  }
  0x3b   :  { %313 = vmatpush3.bf16.msra.mxu0 %v312_v5  ;;  %319 = vmatpush3.bf16.msra.mxu1 %v318_v9  ;;  %v284_v15 = vld [vmem:[%s577_s4] ss:$0 sm:$0xff]  ;;  %s462_s4 = smov [#allocation9]  }
  0x3c   :  { %314 = vmatprep.subr.bf16.mxu0 %v458_v0  ;;  %s268_s12 = sshll.u32 %s462_s4, 4  ;;  %s269_s12 = int_to_ptr.vmem [resolvable:$true] %s268_s12 }
  0x3d   :  { %s401_s13 = scalar_lea.vmem %s269_s12, 32  ;;  %p406_p11 = scmp.lt.s32.totalorder %s269_s12, %s269_s12 }
  0x3e   :  { %309 = vmatmul.mubr.msk.f32.vlgmr.msra.gmra.mrb[0].mxu1 %vm146_vm1, %v63_v11  ;;  %p402_p10 = scmp.ne.s32.totalorder %s269_s12, %s401_s13  ;;  %p407_p12 = scmp.lt.s32.totalorder %s401_s13, %s401_s13 }
  0x3f   :  { %316 = vmatpush3.bf16.msra.mxu0 %v315_v10 }
  0x40   :  { %p408_p13 = por %p407_p12, %p406_p11 }
  0x42   :  { %302 = vmatmul.mubr.msk.f32.vlgmr.msra.gmra.mrb[0].mxu0 %vm72_vm2, %v64_v12  ;;  %p409_p0 = pnand %p408_p13, %p402_p10 }
 0x111   :  { %v216_v13 = vpop.f32.mrb[0].mxu1 }
 0x112   :  { %v310_v14 = vpop.f32.mrb[1].mxu1 }
 0x115   :  { %v142_v16 = vpop.f32.mrb[0].mxu0 }
 0x116   :  { %v217_v17 = vadd.f32 %v216_v13, %v142_v16  ;;  %v303_v18 = vpop.f32.mrb[1].mxu0 }
 0x118   :  { %v226_v19 = vadd.f32 %v284_v15, %v217_v17 }
 0x11a   :  { %v228_v20 = vsel %vm227_vm3, %v226_v19, -inf  ;;  %251 = vst.msk [vmem:[#allocation9] sm:$0x3] %vm250_vm4, %v226_v19 }
 0x11b   :  { %229 = vmax.xlane.f32.xlu0 %v228_v20 }
 0x1a8   :  { %v230_v21 = vpop.xlane.xlu0 %229 }
 0x1a9   :  { %v231_v22 = vsub.f32 %v226_v19, %v230_v21 }
 0x1ab   :  { %v232_v23 = vmul.f32 1.442695, %v231_v22 }
 0x1ad   :  { %331 = vpow2.f32 %v232_v23 }
 0x1b7   :  { %v332_v24 = vpop.eup %331 }
 0x1b8   :  { %235 = vrot.lane.b32.xlu0 %v332_v24, %s461_s0 }
 0x22a   :  { %v236_v25 = vpop.permute.xlu0 %235 }
 0x22b   :  { %v239_v26 = vsel %vm238_vm5, %v236_v25, 0.0 }
 0x22c   :  { %240 = vadd.xlane.f32.xlu1 %v239_v26 }
 0x2b9   :  { %v241_v27 = vpop.xlane.xlu1 %240 }
 0x2ba   :  { %333 = vlog2.f32 %v241_v27 }
 0x2bb   :  { %412 = shalt.err (!%p409_p0)
}
 0x2bc   :  { %s413_s16 = scalar_lea.hbm %s579_s6, 32 }
 0x2bd   :  { %p414_p1 = scmp.ne.s32.totalorder %s579_s6, %s413_s16  ;;  %p417_p2 = scmp.lt.u32.totalorder %s413_s16, %s579_s6 }
 0x2bf   :  { %p419_p3 = pnand %p417_p2, %p414_p1 }
 0x2c1   :  { %422 = shalt.err (!%p419_p3)
}
 0x2c2   :  { %271 = dma.vmem_to_hbm [thread:$0]  %s269_s12, 32, %s579_s6, [#allocation10]  }
 0x2c3   :  { %s463_s22 = smov [#allocation8]  }
 0x2c4   :  { %v334_v28 = vpop.eup %333  ;;  %s258_s23 = sshll.u32 %s463_s22, 4  ;;  %s259_s23 = int_to_ptr.vmem [resolvable:$true] %s258_s23 }
 0x2c5   :  { %v243_v29 = vmul.f32 0.6931472, %v334_v28  ;;  %s423_s24 = scalar_lea.vmem %s259_s23, 32  ;;  %p428_p5 = scmp.lt.s32.totalorder %s259_s23, %s259_s23 }
 0x2c6   :  { %p424_p4 = scmp.ne.s32.totalorder %s259_s23, %s423_s24  ;;  %p429_p6 = scmp.lt.s32.totalorder %s423_s24, %s423_s24 }
 0x2c7   :  { %v244_v30 = vsub.f32 %v231_v22, %v243_v29 }
 0x2c8   :  { %p430_p7 = por %p429_p6, %p428_p5 }
 0x2c9   :  { %246 = vrot.lane.b32.xlu1 %v244_v30, %s461_s0 }
 0x2ca   :  { %p431_p8 = pnand %p430_p7, %p424_p4 }
 0x33b   :  { %v247_v31 = vpop.permute.xlu1 %246 }
 0x33c   :  { %249 = vst.msk [vmem:[#allocation8] sm:$0x3] %vm238_vm5, %v247_v31 }
 0x33d   :  { %434 = shalt.err (!%p431_p8)
}
 0x33e   :  { %s435_s6 = scalar_lea.hbm %s578_s5, 32 }
 0x33f   :  { %p436_p9 = scmp.ne.s32.totalorder %s578_s5, %s435_s6  ;;  %p439_p10 = scmp.lt.u32.totalorder %s435_s6, %s578_s5 }
 0x341   :  { %p441_p11 = pnand %p439_p10, %p436_p9 }
 0x343   :  { %444 = shalt.err (!%p441_p11)
}
 0x344   :  { %261 = dma.vmem_to_hbm [thread:$0]  %s259_s23, 32, %s578_s5, [#allocation4]  }
 0x345   :  { %449 = dma.done.wait [#allocation4], 32  }
 0x346   :  { %450 = vsyncadd [#allocation4], 4294967264 }
 0x347   :  { %451 = dma.done.wait [#allocation10], 32  }
 0x348   :  { %452 = vsyncadd [#allocation10], 4294967264 }
 0x349   :  { %278 = vsyncpa [#allocation3], 1 }
 0x34a   :  { %279 = vsyncpa [#allocation6], 1 }
 0x34b   :  { %280 = vsyncpa [#allocation4], 1 }
 0x34c   :  { %281 = vsyncpa [#allocation10], 1 }

</bundles_post_ra>
